<compile_context>
chip_gen: v7x
topology: tpu7x:2x2x1
jax: 0.10.0
libtpu: 0.0.40
codegen_flags: <defaults>
</compile_context>

<pallas_src>
import math
from functools import partial

import jax
import jax.numpy as jnp
from jax import lax
from jax.experimental import pallas as pl
from jax.experimental.pallas import tpu as pltpu


def _compute_vmem_limit():
    """Generation-aware scoped-VMEM limit: ~96 MiB on v5e/v6e (128 MiB
    physical), ~48 MiB on v7x (64 MiB physical); conservative fallback."""
    try:
        cap = int(pltpu.get_tpu_info().vmem_capacity_bytes)
        return max(32 * 1024 * 1024, min(96 * 1024 * 1024, (cap * 3) // 4))
    except Exception:
        return 48 * 1024 * 1024


_VMEM_LIMIT_BYTES = _compute_vmem_limit()


def _sublane_align(dtype):
    """Second-to-last block-dim alignment: sub-32-bit dtypes pack along
    sublanes (16 for bf16/fp16, 32 for int8/fp8, 8 for f32)."""
    return {4: 8, 2: 16, 1: 32}.get(jnp.dtype(dtype).itemsize, 8)


def _pick_tile(dim, target, align):
    """Largest tile <= target that divides `dim` and is a multiple of `align`.
    Falls back to the full dimension (a full-extent block is always legal)."""
    if dim <= target:
        return dim
    t = (target // align) * align
    while t >= align:
        if dim % t == 0:
            return t
        t -= align
    return dim


# ---------------------------------------------------------------------------
# Tiled projection matmul (optional fused bias), f32 accumulation on the MXU
# ---------------------------------------------------------------------------
def _matmul_kernel(x_ref, w_ref, o_ref, acc_ref):
    @pl.when(pl.program_id(2) == 0)
    def _init():
        acc_ref[...] = jnp.zeros_like(acc_ref)

    acc_ref[...] += jnp.dot(x_ref[...], w_ref[...],
                            preferred_element_type=jnp.float32)

    @pl.when(pl.program_id(2) == pl.num_programs(2) - 1)
    def _store():
        o_ref[...] = acc_ref[...].astype(o_ref.dtype)


def _matmul_bias_kernel(x_ref, w_ref, b_ref, o_ref, acc_ref):
    @pl.when(pl.program_id(2) == 0)
    def _init():
        acc_ref[...] = jnp.zeros_like(acc_ref)

    acc_ref[...] += jnp.dot(x_ref[...], w_ref[...],
                            preferred_element_type=jnp.float32)

    @pl.when(pl.program_id(2) == pl.num_programs(2) - 1)
    def _store():
        o_ref[...] = (acc_ref[...] + b_ref[...].astype(jnp.float32)
                      ).astype(o_ref.dtype)


def pallas_matmul(x, w, b=None, *, tm=512, tn=256, tk=1024):
    """out = x @ w (+ b).  x: (M, K), w: (K, N), b: (N,) or None."""
    M, K = x.shape
    Kw, N = w.shape
    assert K == Kw
    sub = _sublane_align(x.dtype)
    tm = _pick_tile(M, tm, sub)     # second-to-last of x/o blocks: dtype-aware
    tn = _pick_tile(N, tn, 128)     # lane dim: 128-aligned (MXU-width friendly)
    tk = _pick_tile(K, tk, 128)     # lane dim of x block / sublane of w block
    grid = (M // tm, N // tn, K // tk)

    x_spec = pl.BlockSpec((tm, tk), lambda i, j, k: (i, k))
    w_spec = pl.BlockSpec((tk, tn), lambda i, j, k: (k, j))
    o_spec = pl.BlockSpec((tm, tn), lambda i, j, k: (i, j))

    itemsize = jnp.dtype(x.dtype).itemsize
    cost = pl.CostEstimate(
        flops=2 * M * N * K,
        transcendentals=0,
        bytes_accessed=(M * K + K * N + M * N) * itemsize,
    )
    params = pltpu.CompilerParams(
        dimension_semantics=("parallel", "parallel", "arbitrary"),
        vmem_limit_bytes=_VMEM_LIMIT_BYTES,
    )
    scratch = [pltpu.VMEM((tm, tn), jnp.float32)]
    out_shape = jax.ShapeDtypeStruct((M, N), x.dtype)

    if b is None:
        return pl.pallas_call(
            _matmul_kernel,
            out_shape=out_shape, grid=grid,
            in_specs=[x_spec, w_spec], out_specs=o_spec,
            scratch_shapes=scratch, compiler_params=params,
            cost_estimate=cost,
        )(x, w)

    b2 = b.reshape(1, N).astype(x.dtype)
    b_spec = pl.BlockSpec((1, tn), lambda i, j, k: (0, j))
    return pl.pallas_call(
        _matmul_bias_kernel,
        out_shape=out_shape, grid=grid,
        in_specs=[x_spec, w_spec, b_spec], out_specs=o_spec,
        scratch_shapes=scratch, compiler_params=params,
        cost_estimate=cost,
    )(x, w, b2)


# ---------------------------------------------------------------------------
# Flash-style multi-head SDPA reading the packed qkv buffer directly
# ---------------------------------------------------------------------------
def _flash_mha_kernel(q_ref, k_ref, v_ref, o_ref, m_sc, l_sc, acc_sc,
                      *, num_heads, head_dim):
    # q_ref: (1, tq, 1, H, D)   k_ref/v_ref: (1, tk, 1, H, D)   o_ref: (1, tq, C)
    # m_sc/l_sc: (tq, H) f32    acc_sc: (tq, C) f32 (lane-dense, matches o_ref)
    ki = pl.program_id(2)

    @pl.when(ki == 0)
    def _init():
        m_sc[...] = jnp.full_like(m_sc, -jnp.inf)
        l_sc[...] = jnp.zeros_like(l_sc)
        acc_sc[...] = jnp.zeros_like(acc_sc)

    # Static head loop: each head's (tq, tk) score tile is consumed (softmax
    # update + P@V) before the next head, keeping live ranges bounded.
    for h in range(num_heads):
        lo = h * head_dim
        hi = lo + head_dim
        q_h = q_ref[0, :, 0, h, :]              # (tq, D) — scale pre-folded into Wqkv
        k_h = k_ref[0, :, 0, h, :]              # (tk, D)
        v_h = v_ref[0, :, 0, h, :]              # (tk, D)

        # Scores: contract the D axes directly (no explicit k transpose).
        s = lax.dot_general(q_h, k_h, (((1,), (1,)), ((), ())),
                            preferred_element_type=jnp.float32)   # (tq, tk) f32

        m_prev = m_sc[:, h:h + 1]               # (tq, 1) f32
        m_new = jnp.maximum(m_prev, jnp.max(s, axis=-1, keepdims=True))
        alpha = jnp.exp(m_prev - m_new)
        p = jnp.exp(s - m_new)                  # (tq, tk) f32
        l_sc[:, h:h + 1] = alpha * l_sc[:, h:h + 1] + jnp.sum(p, axis=-1,
                                                              keepdims=True)
        acc_sc[:, lo:hi] = alpha * acc_sc[:, lo:hi] + jnp.dot(
            p.astype(v_h.dtype), v_h, preferred_element_type=jnp.float32)
        m_sc[:, h:h + 1] = m_new

    @pl.when(ki == pl.num_programs(2) - 1)
    def _finalize():
        # Normalize per head in VMEM scratch, then a single lane-dense (tq, C)
        # store to HBM (no masked 64-lane-wide partial stores on the output).
        for h in range(num_heads):
            lo = h * head_dim
            hi = lo + head_dim
            inv = pl.reciprocal(l_sc[:, h:h + 1], approx=True)    # EUP
            acc_sc[:, lo:hi] = acc_sc[:, lo:hi] * inv
        o_ref[0] = acc_sc[...].astype(o_ref.dtype)


def pallas_flash_mha(qkv, *, tq=256, tk=512):
    """qkv: (B, N, 3, H, D) packed projections (q already scaled).
    Returns (B, N, H*D)."""
    B, N, three, H, D = qkv.shape
    assert three == 3
    C = H * D
    sub = _sublane_align(qkv.dtype)
    tq = _pick_tile(N, tq, max(sub, 8))
    tk = _pick_tile(N, tk, max(sub, 8))
    grid = (B, N // tq, N // tk)   # kv-reduction axis last ("arbitrary")
    # v7x note: B and q-tile axes are "parallel"; keep B*(N/tq) >= 2 (and even)
    # so both TensorCores get balanced work.

    q_spec = pl.BlockSpec((1, tq, 1, H, D), lambda b, qi, ki: (b, qi, 0, 0, 0))
    k_spec = pl.BlockSpec((1, tk, 1, H, D), lambda b, qi, ki: (b, ki, 1, 0, 0))
    v_spec = pl.BlockSpec((1, tk, 1, H, D), lambda b, qi, ki: (b, ki, 2, 0, 0))
    o_spec = pl.BlockSpec((1, tq, C), lambda b, qi, ki: (b, qi, 0))

    itemsize = jnp.dtype(qkv.dtype).itemsize
    cost = pl.CostEstimate(
        flops=4 * B * H * N * N * D,            # q@k^T and p@v
        transcendentals=B * H * N * N,          # exp
        bytes_accessed=(3 * B * N * C + B * N * C) * itemsize,
    )
    return pl.pallas_call(
        partial(_flash_mha_kernel, num_heads=H, head_dim=D),
        out_shape=jax.ShapeDtypeStruct((B, N, C), qkv.dtype),
        grid=grid,
        in_specs=[q_spec, k_spec, v_spec],
        out_specs=o_spec,
        scratch_shapes=[
            pltpu.VMEM((tq, H), jnp.float32),   # running max  (per head in lanes)
            pltpu.VMEM((tq, H), jnp.float32),   # running denominator
            pltpu.VMEM((tq, C), jnp.float32),   # lane-dense output accumulator
        ],
        compiler_params=pltpu.CompilerParams(
            dimension_semantics=("parallel", "parallel", "arbitrary"),
            vmem_limit_bytes=_VMEM_LIMIT_BYTES,
        ),
        cost_estimate=cost,
    )(qkv, qkv, qkv)


# ---------------------------------------------------------------------------
# Attention module (forward only, use_sdpa=True path, dropout p = 0)
# ---------------------------------------------------------------------------
class AttentionPallas:
    def __init__(self, dim, num_heads=8, qkv_bias=False, qk_scale=None,
                 attn_drop=0.0, proj_drop=0.0, use_sdpa=True, key=None):
        assert dim % num_heads == 0
        self.dim = dim
        self.num_heads = num_heads
        head_dim = dim // num_heads
        # Kept for parity with the PyTorch module; its use_sdpa=True branch
        # calls scaled_dot_product_attention with scale=None, i.e. it always
        # uses 1/sqrt(head_dim) and ignores qk_scale.
        self.scale = qk_scale or head_dim ** (-0.5)
        self.sdpa_scale = 1.0 / math.sqrt(head_dim)
        self.use_sdpa = use_sdpa

        if key is None:
            key = jax.random.PRNGKey(0)
        k1, k2, k3, k4 = jax.random.split(key, 4)
        bound = 1.0 / math.sqrt(dim)
        # Weights stored (in_features, out_features) so forward is x @ W.
        self.w_qkv = jax.random.uniform(k1, (dim, 3 * dim), jnp.float32, -bound, bound)
        self.b_qkv = (jax.random.uniform(k4, (3 * dim,), jnp.float32, -bound, bound)
                      if qkv_bias else None)
        self.w_proj = jax.random.uniform(k2, (dim, dim), jnp.float32, -bound, bound)
        self.b_proj = jax.random.uniform(k3, (dim,), jnp.float32, -bound, bound)

        # Fold the SDPA softmax scale into the q columns of the qkv projection
        # (done in f32, BEFORE any dtype cast) — removes the per-kv-step scale.
        scale_vec = jnp.concatenate([
            jnp.full((dim,), self.sdpa_scale, jnp.float32),
            jnp.ones((2 * dim,), jnp.float32)])
        self._w_qkv_scaled = self.w_qkv * scale_vec[None, :]
        self._b_qkv_scaled = None if self.b_qkv is None else self.b_qkv * scale_vec
        self._param_cache = {}   # dtype -> pre-cast kernel weights (cast once)
        # TODO(synk): attn_drop / proj_drop omitted — default p=0.0 is the identity;
        # non-zero p would need pltpu.prng_seed / prng_random_bits inside the kernels.

    def _params_for(self, dtype):
        key = jnp.dtype(dtype)
        params = self._param_cache.get(key)
        if params is None:
            params = (
                self._w_qkv_scaled.astype(key),
                None if self._b_qkv_scaled is None else self._b_qkv_scaled.astype(key),
                self.w_proj.astype(key),
                self.b_proj.astype(key),
            )
            self._param_cache[key] = params
        return params

    def __call__(self, x, mask=None):
        if mask is not None:
            # The reference use_sdpa=True branch never passes the mask to SDPA.
            raise NotImplementedError("mask is unused by the reference sdpa path")
        B, N, C = x.shape
        H = self.num_heads
        D = C // H
        w_qkv, b_qkv, w_proj, b_proj = self._params_for(x.dtype)

        # qkv projection: (B*N, C) @ (C, 3C)  [tiled Pallas matmul, f32 accum]
        qkv = pallas_matmul(x.reshape(B * N, C), w_qkv, b_qkv)
        # Free row-major reshape — the q/k/v split and per-head layout are
        # handled by the attention kernel's BlockSpec index_maps (no transposes).
        qkv5 = qkv.reshape(B, N, 3, H, D)

        # Flash SDPA; writes directly in (B, N, C) layout (heads already merged).
        o = pallas_flash_mha(qkv5)

        # Output projection with fused bias.
        out = pallas_matmul(o.reshape(B * N, C), w_proj, b_proj)
        return out.reshape(B, N, C), None


# ---------------------------------------------------------------------------
# Reference (pure JAX, f32) for the correctness check
# ---------------------------------------------------------------------------
def reference_forward(mod, x):
    B, N, C = x.shape
    H = mod.num_heads
    D = C // H
    xf = x.astype(jnp.float32)
    qkv = xf.reshape(B * N, C) @ mod.w_qkv
    if mod.b_qkv is not None:
        qkv = qkv + mod.b_qkv
    qkv = qkv.reshape(B, N, 3, H, D).transpose(2, 0, 3, 1, 4)
    q, k, v = qkv[0], qkv[1], qkv[2]
    s = jnp.einsum("bhnd,bhmd->bhnm", q, k) / math.sqrt(D)
    p = jax.nn.softmax(s, axis=-1)
    o = jnp.einsum("bhnm,bhmd->bhnd", p, v)
    o = o.transpose(0, 2, 1, 3).reshape(B * N, C)
    return (o @ mod.w_proj + mod.b_proj).reshape(B, N, C)


if __name__ == "__main__":
    key = jax.random.PRNGKey(0)
    kx, kp = jax.random.split(key)

    B, N, C, H = 2, 16, 32, 4      # head_dim = 8
    x = jax.random.normal(kx, (B, N, C), jnp.float32)

    attn = AttentionPallas(dim=C, num_heads=H, qkv_bias=True, key=kp)
    out, attn_weights = attn(x)
    out = jax.block_until_ready(out)

    ref = reference_forward(attn, x)
    assert out.shape == (B, N, C)
    assert attn_weights is None
    err = float(jnp.max(jnp.abs(out - ref)))
    assert err < 1e-2, f"f32 max abs err = {err}"

    # bf16 MXU-feed path (production setting: bf16 inputs/weights, f32 accum).
    out_bf16, _ = attn(x.astype(jnp.bfloat16))
    out_bf16 = jax.block_until_ready(out_bf16)
    err_bf16 = float(jnp.max(jnp.abs(out_bf16.astype(jnp.float32) - ref)))
    assert err_bf16 < 1e-1, f"bf16 max abs err = {err_bf16}"

    print("KERNEL_OK")
</pallas_src>

<mosaic_0001>
module attributes {stable_mosaic.version = 11 : i64} {
  func.func @_matmul_bias_kernel(%arg0: i32, %arg1: i32, %arg2: i32, %arg3: memref<32x32xf32, #tpu.memory_space<vmem>>, %arg4: memref<32x96xf32, #tpu.memory_space<vmem>>, %arg5: memref<1x96xf32, #tpu.memory_space<vmem>>, %arg6: memref<32x96xf32, #tpu.memory_space<vmem>>, %arg7: memref<32x96xf32, #tpu.memory_space<vmem>>) attributes {dimension_semantics = [#tpu.dimension_semantics<parallel>, #tpu.dimension_semantics<parallel>, #tpu.dimension_semantics<arbitrary>], iteration_bounds = array<i64: 1, 1, 1>, scalar_prefetch = 0 : i64, scratch_operands = 1 : i64, tpu.core_type = #tpu.core_type<tc>, window_params = [{transform_indices = @transform_0, window_bounds = array<i64: 32, 32>}, {transform_indices = @transform_1, window_bounds = array<i64: 32, 96>}, {transform_indices = @transform_2, window_bounds = array<i64: 1, 96>}, {transform_indices = @transform_3, window_bounds = array<i64: 32, 96>}]} {
    %c0_i32 = arith.constant 0 : i32
    %0 = arith.cmpi eq, %arg2, %c0_i32 : i32
    %1 = arith.extui %0 : i1 to i32
    %c0_i32_0 = arith.constant 0 : i32
    %2 = arith.cmpi ne, %1, %c0_i32_0 : i32
    scf.if %2 {
      %cst_10 = arith.constant 0.000000e+00 : f32
      %12 = vector.broadcast %cst_10 : f32 to vector<32x96xf32>
      %c0_11 = arith.constant 0 : index
      %c0_12 = arith.constant 0 : index
      %13 = vector.load %arg7[%c0_11, %c0_12] : memref<32x96xf32, #tpu.memory_space<vmem>>, vector<32x96xf32>
      tpu.vector_store %arg7[%c0_11, %c0_12], %12 {strides = array<i32>} : memref<32x96xf32, #tpu.memory_space<vmem>>, vector<32x96xf32>,
    } else {
    }
    %c0 = arith.constant 0 : index
    %c0_1 = arith.constant 0 : index
    %3 = vector.load %arg7[%c0, %c0_1] : memref<32x96xf32, #tpu.memory_space<vmem>>, vector<32x96xf32>
    %c0_2 = arith.constant 0 : index
    %c0_3 = arith.constant 0 : index
    %4 = vector.load %arg3[%c0_2, %c0_3] : memref<32x32xf32, #tpu.memory_space<vmem>>, vector<32x32xf32>
    %c0_4 = arith.constant 0 : index
    %c0_5 = arith.constant 0 : index
    %5 = vector.load %arg4[%c0_4, %c0_5] : memref<32x96xf32, #tpu.memory_space<vmem>>, vector<32x96xf32>
    %cst = arith.constant dense<0.000000e+00> : vector<32x96xf32>
    %6 = tpu.matmul %4, %5, %cst {dimension_numbers = #tpu.dot_dimension_numbers<[1], [0], [0], [1], [0, 0, 1, 1], [], []>} : vector<32x32xf32>, vector<32x96xf32>, vector<32x96xf32> -> vector<32x96xf32>
    %7 = arith.addf %3, %6 : vector<32x96xf32>
    %c0_6 = arith.constant 0 : index
    %c0_7 = arith.constant 0 : index
    %8 = vector.load %arg7[%c0_6, %c0_7] : memref<32x96xf32, #tpu.memory_space<vmem>>, vector<32x96xf32>
    tpu.vector_store %arg7[%c0_6, %c0_7], %7 {strides = array<i32>} : memref<32x96xf32, #tpu.memory_space<vmem>>, vector<32x96xf32>,
    %c0_i32_8 = arith.constant 0 : i32
    %9 = arith.cmpi eq, %arg2, %c0_i32_8 : i32
    %10 = arith.extui %9 : i1 to i32
    %c0_i32_9 = arith.constant 0 : i32
    %11 = arith.cmpi ne, %10, %c0_i32_9 : i32
    scf.if %11 {
      %c0_10 = arith.constant 0 : index
      %c0_11 = arith.constant 0 : index
      %12 = vector.load %arg7[%c0_10, %c0_11] : memref<32x96xf32, #tpu.memory_space<vmem>>, vector<32x96xf32>
      %c0_12 = arith.constant 0 : index
      %c0_13 = arith.constant 0 : index
      %13 = vector.load %arg5[%c0_12, %c0_13] : memref<1x96xf32, #tpu.memory_space<vmem>>, vector<1x96xf32>
      %14 = vector.broadcast %13 : vector<1x96xf32> to vector<32x96xf32>
      %15 = arith.addf %12, %14 : vector<32x96xf32>
      %c0_14 = arith.constant 0 : index
      %c0_15 = arith.constant 0 : index
      %16 = vector.load %arg6[%c0_14, %c0_15] : memref<32x96xf32, #tpu.memory_space<vmem>>, vector<32x96xf32>
      tpu.vector_store %arg6[%c0_14, %c0_15], %15 {strides = array<i32>} : memref<32x96xf32, #tpu.memory_space<vmem>>, vector<32x96xf32>,
    } else {
    }
    return
  }
  func.func @transform_0(%arg0: i32, %arg1: i32, %arg2: i32) -> (i32, i32) {
    %c0_i32 = arith.constant 0 : i32
    return %arg0, %arg2 : i32, i32
  }
  func.func @transform_1(%arg0: i32, %arg1: i32, %arg2: i32) -> (i32, i32) {
    %c0_i32 = arith.constant 0 : i32
    return %arg2, %arg1 : i32, i32
  }
  func.func @transform_2(%arg0: i32, %arg1: i32, %arg2: i32) -> (i32, i32) {
    %c0_i32 = arith.constant 0 : i32
    %c0_i32_0 = arith.constant 0 : i32
    return %c0_i32, %arg1 : i32, i32
  }
  func.func @transform_3(%arg0: i32, %arg1: i32, %arg2: i32) -> (i32, i32) {
    %c0_i32 = arith.constant 0 : i32
    return %arg0, %arg1 : i32, i32
  }
}

</mosaic_0001>

<bundles_post_ra>
// kernel: tpu_custom_call.1
= control target key start
LH: loop header
LB: loop body
LE: loop exit
PB: predicated region body
PF: predicated region fallthrough
CT: control target
= control target key end

     0   :  { %8 = vsyncpa [#allocation4], 0  ;;  %s418_s0 = inlined_call_operand.hbm [shape: f32[32,32], index: 0, kind: input, shape index: {}]   ;;  %s419_s1 = inlined_call_operand.hbm [shape: f32[32,96], index: 1, kind: input, shape index: {}]   ;;  %s420_s2 = inlined_call_operand.vmem [shape: f32[1,96], index: 2, kind: input, shape index: {}]   ;;  %s421_s3 = inlined_call_operand.hbm [shape: f32[32,96], index: 3, kind: output, shape index: {}]  }
   0x1   :  { %9 = vsyncpa [#allocation7], 0 }
   0x2   :  { %10 = vsyncpa [#allocation5], 0  ;;  %s328_s12 = smov [#allocation3]   ;;  %s256_s16 = scalar_lea.hbm %s418_s0, 512 }
   0x3   :  { %s16_s13 = sshll.u32 %s328_s12, 4  ;;  %p257_p0 = scmp.ne.s32.totalorder %s418_s0, %s256_s16  ;;  %s17_s13 = int_to_ptr.vmem [resolvable:$true] %s16_s13 }
   0x4   :  { %p260_p1 = scmp.lt.u32.totalorder %s256_s16, %s418_s0 }
   0x6   :  { %p262_p2 = pnand %p260_p1, %p257_p0 }
   0x8   :  { %265 = shalt.err (!%p262_p2)
}
   0x9   :  { %s266_s21 = scalar_lea.vmem %s17_s13, 512  ;;  %p271_p4 = scmp.lt.s32.totalorder %s17_s13, %s17_s13 }
   0xa   :  { %p267_p3 = scmp.ne.s32.totalorder %s17_s13, %s266_s21  ;;  %p272_p5 = scmp.lt.s32.totalorder %s266_s21, %s266_s21 }
   0xc   :  { %p273_p6 = por %p272_p5, %p271_p4 }
   0xe   :  { %p274_p7 = pnand %p273_p6, %p267_p3 }
  0x10   :  { %277 = shalt.err (!%p274_p7)
}
  0x11   :  { %s329_s22 = smov 128   ;;  %s330_s23 = smov 8  }
  0x12   :  { %22 = dma.hbm_to_vmem [thread:$0]  %s418_s0, 512, %s17_s13, [#allocation4], %s329_s22, %s329_s22, %s330_s23  }
  0x13   :  { %s331_s26 = smov [#allocation6]   ;;  %s278_s30 = scalar_lea.hbm %s419_s1, 512 }
  0x14   :  { %s28_s27 = sshll.u32 %s331_s26, 4  ;;  %p279_p8 = scmp.ne.s32.totalorder %s419_s1, %s278_s30  ;;  %s29_s27 = int_to_ptr.vmem [resolvable:$true] %s28_s27 }
  0x15   :  { %p282_p9 = scmp.lt.u32.totalorder %s278_s30, %s419_s1 }
  0x17   :  { %p284_p10 = pnand %p282_p9, %p279_p8 }
  0x19   :  { %287 = shalt.err (!%p284_p10)
}
  0x1a   :  { %s288_s8 = scalar_lea.vmem %s29_s27, 512  ;;  %p293_p12 = scmp.lt.s32.totalorder %s29_s27, %s29_s27 }
  0x1b   :  { %p289_p11 = scmp.ne.s32.totalorder %s29_s27, %s288_s8  ;;  %p294_p13 = scmp.lt.s32.totalorder %s288_s8, %s288_s8 }
  0x1d   :  { %p295_p0 = por %p294_p13, %p293_p12 }
  0x1f   :  { %p296_p1 = pnand %p295_p0, %p289_p11 }
  0x21   :  { %299 = shalt.err (!%p296_p1)
}
  0x22   :  { %34 = dma.hbm_to_vmem [thread:$0]  %s419_s1, 512, %s29_s27, [#allocation7], %s329_s22, %s329_s22, %s330_s23  }
  0x23   :  { %322 = dma.done.wait [#allocation4], 512  }
  0x24   :  { %323 = vsyncadd [#allocation4], 4294966784 }
  0x25   :  { %324 = dma.done.wait [#allocation7], 512  }
  0x26   :  { %325 = vsyncadd [#allocation7], 4294966784  ;;  %vm47_vm0 = vcmask 785408   ;;  %v332_v0 = vmov 0.0   ;;  %vm64_vm1 = vcmask 261120   ;;  %v60_v1 = vld [vmem:[#allocation6] sm:$0xff] }
  0x27   :  { %49 = vst.msk [vmem:[#allocation2 + $0x8] sm:$0xff] %vm47_vm0, %v332_v0  ;;  %48 = vst.msk [vmem:[#allocation2] sm:$0xff] %vm47_vm0, %v332_v0  ;;  %v61_v2 = vld [vmem:[#allocation6 + $0x8] sm:$0xff]  ;;  %v62_v3 = vld [vmem:[#allocation6 + $0x10] sm:$0xff]  ;;  %s333_s11 = smov [#allocation8]  }
  0x28   :  { %50 = vst.msk [vmem:[#allocation2 + $0x10] sm:$0xff] %vm47_vm0, %v332_v0  ;;  %51 = vst.msk [vmem:[#allocation2 + $0x18] sm:$0xff] %vm47_vm0, %v332_v0  ;;  %v238_v4 = vpack.c.bf16 %v61_v2, %v60_v1  ;;  %v63_v5 = vld [vmem:[#allocation6 + $0x18] sm:$0xff]  ;;  %v56_v6 = vld [vmem:[#allocation3] sm:$0xff]  ;;  %s198_s12 = sshll.u32 %s333_s11, 4  ;;  %s199_s12 = int_to_ptr.vmem [resolvable:$true] %s198_s12 }
  0x29   :  { %v58_v7 = vld [vmem:[#allocation3 + $0x10] sm:$0xff]  ;;  %v242_v8 = vpack.c.bf16 %v63_v5, %v62_v3  ;;  %232 = vmatprep.mubr.msk.f32.mxu0 %vm64_vm1, %v56_v6  ;;  %v57_v9 = vld [vmem:[#allocation3 + $0x8] sm:$0xff]  ;;  %v59_v10 = vld [vmem:[#allocation3 + $0x18] sm:$0xff]  ;;  %p305_p3 = scmp.lt.s32.totalorder %s199_s12, %s199_s12 }
  0x2a   :  { %235 = vmatprep.mubr.msk.f32.mxu1 %vm64_vm1, %v58_v7  ;;  %239 = vmatprep.subr.bf16.mxu0 %v238_v4  ;;  %v215_v23 = vld [vmem:[%s420_s2] ss:$0 sm:$0xff]  ;;  %s300_s2 = scalar_lea.vmem %s199_s12, 512 }
  0x2b   :  { %246 = vmatprep.subr.bf16.mxu1 %v238_v4  ;;  %241 = vmatpush3.bf16.msra.mxu0 %v238_v4  ;;  %p301_p2 = scmp.ne.s32.totalorder %s199_s12, %s300_s2  ;;  %p306_p4 = scmp.lt.s32.totalorder %s300_s2, %s300_s2 }
  0x2c   :  { %248 = vmatpush3.bf16.msra.mxu1 %v238_v4  ;;  %243 = vmatprep.subr.bf16.mxu0 %v242_v8 }
  0x2d   :  { %247 = vmatprep.subr.bf16.mxu1 %v242_v8  ;;  %p307_p5 = por %p306_p4, %p305_p3 }
  0x2e   :  { %v53_v11 = vld [vmem:[#allocation2 + $0x8] sm:$0xff]  ;;  %v52_v13 = vld [vmem:[#allocation2] sm:$0xff] }
  0x2f   :  { %245 = vmatpush3.bf16.msra.mxu0 %v242_v8  ;;  %v55_v12 = vld [vmem:[#allocation2 + $0x18] sm:$0xff]  ;;  %v54_v14 = vld [vmem:[#allocation2 + $0x10] sm:$0xff]  ;;  %p308_p6 = pnand %p307_p5, %p301_p2 }
  0x30   :  { %249 = vmatpush3.bf16.msra.mxu1 %v242_v8 }
  0x32   :  { %233 = vmatmul.mubr.msk.f32.vlgmr.msra.gmra.mrb[0].mxu0 %vm64_vm1, %v57_v9 }
  0x33   :  { %236 = vmatmul.mubr.msk.f32.vlgmr.msra.gmra.mrb[0].mxu1 %vm64_vm1, %v59_v10 }
 0x105   :  { %v234_v15 = vpop.f32.mrb[0].mxu0 }
 0x106   :  { %v237_v16 = vpop.f32.mrb[0].mxu1  ;;  %v163_v17 = vadd.f32 %v234_v15, %v53_v11  ;;  %v143_v19 = vpop.f32.mrb[1].mxu0 }
 0x107   :  { %v165_v18 = vadd.f32 %v237_v16, %v55_v12  ;;  %v153_v20 = vpop.f32.mrb[1].mxu1  ;;  %v162_v21 = vadd.f32 %v143_v19, %v52_v13 }
 0x108   :  { %v164_v22 = vadd.f32 %v153_v20, %v54_v14  ;;  %168 = vst.msk [vmem:[#allocation2 + $0x8] sm:$0xff] %vm47_vm0, %v163_v17 }
 0x109   :  { %170 = vst.msk [vmem:[#allocation2 + $0x18] sm:$0xff] %vm47_vm0, %v165_v18  ;;  %167 = vst.msk [vmem:[#allocation2] sm:$0xff] %vm47_vm0, %v162_v21 }
 0x10a   :  { %169 = vst.msk [vmem:[#allocation2 + $0x10] sm:$0xff] %vm47_vm0, %v164_v22 }
 0x10f   :  { %v175_v24 = vld [vmem:[#allocation2 + $0x8] sm:$0xff] }
 0x110   :  { %v177_v25 = vld [vmem:[#allocation2 + $0x18] sm:$0xff]  ;;  %v174_v26 = vld [vmem:[#allocation2] sm:$0xff]  ;;  %v186_v28 = vadd.f32 %v215_v23, %v175_v24 }
 0x111   :  { %v176_v27 = vld [vmem:[#allocation2 + $0x10] sm:$0xff]  ;;  %v188_v29 = vadd.f32 %v215_v23, %v177_v25  ;;  %v185_v30 = vadd.f32 %v215_v23, %v174_v26 }
 0x112   :  { %v187_v31 = vadd.f32 %v215_v23, %v176_v27  ;;  %190 = vst.msk [vmem:[#allocation8 + $0x8] sm:$0xff] %vm47_vm0, %v186_v28 }
 0x113   :  { %192 = vst.msk [vmem:[#allocation8 + $0x18] sm:$0xff] %vm47_vm0, %v188_v29  ;;  %189 = vst.msk [vmem:[#allocation8] sm:$0xff] %vm47_vm0, %v185_v30 }
 0x114   :  { %191 = vst.msk [vmem:[#allocation8 + $0x10] sm:$0xff] %vm47_vm0, %v187_v31 }
 0x115   :  { %311 = shalt.err (!%p308_p6)
}
 0x116   :  { %s312_s15 = scalar_lea.hbm %s421_s3, 512 }
 0x117   :  { %p313_p7 = scmp.ne.s32.totalorder %s421_s3, %s312_s15  ;;  %p316_p8 = scmp.lt.u32.totalorder %s312_s15, %s421_s3 }
 0x119   :  { %p318_p9 = pnand %p316_p8, %p313_p7 }
 0x11b   :  { %321 = shalt.err (!%p318_p9)
}
 0x11c   :  { %204 = dma.vmem_to_hbm [thread:$0]  %s199_s12, 512, %s421_s3, [#allocation5], %s329_s22, %s329_s22, %s330_s23  }
 0x11d   :  { %326 = dma.done.wait [#allocation5], 512  }
 0x11e   :  { %327 = vsyncadd [#allocation5], 4294966784 }
 0x11f   :  { %208 = vsyncpa [#allocation4], 1 }
 0x120   :  { %209 = vsyncpa [#allocation7], 1 }
 0x121   :  { %210 = vsyncpa [#allocation5], 1 }

</bundles_post_ra>
